<compile_context>
chip_gen: v7x
topology: tpu7x:2x2x1
jax: 0.10.0
libtpu: 0.0.40
codegen_flags: <defaults>
</compile_context>

<pallas_src>
import functools
import math

import jax
import jax.numpy as jnp
from jax.experimental import pallas as pl
from jax.experimental.pallas import tpu as pltpu

_VMEM_LIMIT = 48 * 1024 * 1024  # fits v7x's 64 MiB with headroom; > default scoped


def _round_up(x, m):
    return (x + m - 1) // m * m


def _pick_row_tile(n):
    if n >= 256:
        return 256
    return _round_up(n, 8)


def _pick_seq_tile(s):
    for t in (256, 128):
        if s % t == 0:
            return t
    return s


# ---------------------------------------------------------------------------
# Kernel 1: linear projection (also used for the fused (D,3D) QKV weight).
# ---------------------------------------------------------------------------
def _linear_kernel(x_ref, w_ref, b_ref, o_ref, *, compute_dtype):
    x = x_ref[...]
    if compute_dtype is not None:
        x = x.astype(compute_dtype)
    o_ref[...] = (jnp.dot(x, w_ref[...], preferred_element_type=jnp.float32)
                  + b_ref[...]).astype(o_ref.dtype)


def _qkv_proj_kernel(xq_ref, xk_ref, xv_ref,
                     wq_ref, wk_ref, wv_ref,
                     bq_ref, bk_ref, bv_ref,
                     q_ref, k_ref, v_ref, *, compute_dtype):
    def proj(x_ref, w_ref, b_ref, o_ref):
        x = x_ref[...]
        if compute_dtype is not None:
            x = x.astype(compute_dtype)
        o_ref[...] = (jnp.dot(x, w_ref[...], preferred_element_type=jnp.float32)
                      + b_ref[...]).astype(o_ref.dtype)

    proj(xq_ref, wq_ref, bq_ref, q_ref)
    proj(xk_ref, wk_ref, bk_ref, k_ref)
    proj(xv_ref, wv_ref, bv_ref, v_ref)


# ---------------------------------------------------------------------------
# Kernel 2: flash-style attention with online softmax.
#   grid = (B, h, Sq//tq, Skv//tk); KV axis is the (last, "arbitrary") reduction.
# ---------------------------------------------------------------------------
def _flash_attn_body(q_ref, k_ref, v_ref, bias_ref, o_ref,
                     m_ref, l_ref, acc_ref, compute_dtype):
    ki = pl.program_id(3)

    @pl.when(ki == 0)
    def _():
        m_ref[...] = jnp.full(m_ref.shape, -jnp.inf, jnp.float32)
        l_ref[...] = jnp.zeros(l_ref.shape, jnp.float32)
        acc_ref[...] = jnp.zeros(acc_ref.shape, jnp.float32)

    q = q_ref[0, 0]   # (tq, d_k)
    k = k_ref[0, 0]   # (tk, d_k)
    v = v_ref[0, 0]   # (tk, d_k)
    if compute_dtype is not None:
        q = q.astype(compute_dtype)
        k = k.astype(compute_dtype)
        v = v.astype(compute_dtype)

    # 1/sqrt(d_k) is folded into W_q / b_q at trace time; f32 accumulation.
    s = jnp.einsum('qd,kd->qk', q, k, preferred_element_type=jnp.float32)
    if bias_ref is not None:
        s = s + bias_ref[0]          # (tq,tk) or (1,tk) additive bias, f32

    m_prev = m_ref[...]
    m_new = jnp.maximum(m_prev, jnp.max(s, axis=-1, keepdims=True))
    alpha = jnp.exp(m_prev - m_new)
    p = jnp.exp(s - m_new)
    l_ref[...] = alpha * l_ref[...] + jnp.sum(p, axis=-1, keepdims=True)
    pv = jnp.dot(p.astype(v.dtype), v, preferred_element_type=jnp.float32)
    acc_ref[...] = alpha * acc_ref[...] + pv
    m_ref[...] = m_new

    @pl.when(ki == pl.num_programs(3) - 1)
    def _():
        o_ref[0, 0] = (acc_ref[...] / l_ref[...]).astype(o_ref.dtype)


def _flash_attn_bias_kernel(q_ref, k_ref, v_ref, bias_ref, o_ref,
                            m_ref, l_ref, acc_ref, *, compute_dtype):
    _flash_attn_body(q_ref, k_ref, v_ref, bias_ref, o_ref,
                     m_ref, l_ref, acc_ref, compute_dtype)


def _flash_attn_nobias_kernel(q_ref, k_ref, v_ref, o_ref,
                              m_ref, l_ref, acc_ref, *, compute_dtype):
    _flash_attn_body(q_ref, k_ref, v_ref, None, o_ref,
                     m_ref, l_ref, acc_ref, compute_dtype)


# ---------------------------------------------------------------------------
# Kernel 3: output projection, reads ctx in (B, h, S, d_k) layout directly
# (no head-merge transpose) and writes a lane-dense (1, ts, D) block.
# ---------------------------------------------------------------------------
def _out_proj_kernel(x_ref, w_ref, b_ref, o_ref, *, num_heads, compute_dtype):
    ts = x_ref.shape[2]
    d_model = w_ref.shape[2]
    acc = jnp.zeros((ts, d_model), jnp.float32)
    for i in range(num_heads):
        xi = x_ref[0, i]              # (ts, d_k)
        if compute_dtype is not None:
            xi = xi.astype(compute_dtype)
        acc = acc + jnp.dot(xi, w_ref[i], preferred_element_type=jnp.float32)
    o_ref[0] = (acc + b_ref[...]).astype(o_ref.dtype)


# ---------------------------------------------------------------------------
# Wrapper == MultiHeadedAttention.forward (inference; dropout = identity).
# ---------------------------------------------------------------------------
def multi_headed_attention(q, k, v, mask, params, h, *, compute_dtype=None):
    B, S, D = q.shape
    assert D % h == 0
    d_k = D // h
    wq, bq, wk, bk, wv, bv, wo, bo = params
    dtype = q.dtype
    sm_scale = 1.0 / math.sqrt(d_k)

    # --- trace-time weight prep (no in-kernel transposes) ---
    # nn.Linear: y = x @ W.T + b.  Fold 1/sqrt(d_k) into W_q / b_q.
    wq_t = wq.T * sm_scale
    wk_t, wv_t = wk.T, wv.T
    wo_heads = wo.T.reshape(h, d_k, D)           # head-wise out-projection weight
    w_dtype = compute_dtype if compute_dtype is not None else dtype
    wq_t = wq_t.astype(w_dtype)
    wk_t = wk_t.astype(w_dtype)
    wv_t = wv_t.astype(w_dtype)
    wo_heads = wo_heads.astype(w_dtype)
    bq_r = (bq * sm_scale).reshape(1, D).astype(jnp.float32)
    bk_r = bk.reshape(1, D).astype(jnp.float32)
    bv_r = bv.reshape(1, D).astype(jnp.float32)
    bo_r = bo.reshape(1, D).astype(jnp.float32)

    # --- Q/K/V projections over flattened, padded rows ---
    N = B * S
    tm = _pick_row_tile(N)
    Np = _round_up(N, tm)
    n_row_tiles = Np // tm

    def pad_rows(x2d):
        return x2d if Np == N else jnp.pad(x2d, ((0, Np - N), (0, 0)))

    row_spec = pl.BlockSpec((tm, D), lambda i: (i, 0))
    b_spec = pl.BlockSpec((1, D), lambda i: (0, 0))
    cparams_rows = pltpu.CompilerParams(dimension_semantics=("parallel",),
                                        vmem_limit_bytes=_VMEM_LIMIT)

    self_attention = (q is k) and (k is v)
    if self_attention:
        # Fused QKV: read activations once, one (tm,D)x(D,3D) matmul per tile.
        w_qkv = jnp.concatenate([wq_t, wk_t, wv_t], axis=1)      # (D, 3D)
        b_qkv = jnp.concatenate([bq_r, bk_r, bv_r], axis=1)      # (1, 3D)
        x2d = pad_rows(q.reshape(N, D))
        qkv = pl.pallas_call(
            functools.partial(_linear_kernel, compute_dtype=compute_dtype),
            out_shape=jax.ShapeDtypeStruct((Np, 3 * D), dtype),
            grid=(n_row_tiles,),
            in_specs=[row_spec,
                      pl.BlockSpec((D, 3 * D), lambda i: (0, 0)),
                      pl.BlockSpec((1, 3 * D), lambda i: (0, 0))],
            out_specs=pl.BlockSpec((tm, 3 * D), lambda i: (i, 0)),
            compiler_params=cparams_rows,
        )(x2d, w_qkv, b_qkv)
        q_p, k_p, v_p = qkv[:N, :D], qkv[:N, D:2 * D], qkv[:N, 2 * D:]
    else:
        xq, xk, xv = pad_rows(q.reshape(N, D)), pad_rows(k.reshape(N, D)), pad_rows(v.reshape(N, D))
        w_spec = pl.BlockSpec((D, D), lambda i: (0, 0))
        q_p, k_p, v_p = pl.pallas_call(
            functools.partial(_qkv_proj_kernel, compute_dtype=compute_dtype),
            out_shape=tuple(jax.ShapeDtypeStruct((Np, D), dtype) for _ in range(3)),
            grid=(n_row_tiles,),
            in_specs=[row_spec] * 3 + [w_spec] * 3 + [b_spec] * 3,
            out_specs=tuple(pl.BlockSpec((tm, D), lambda i: (i, 0)) for _ in range(3)),
            compiler_params=cparams_rows,
        )(xq, xk, xv, wq_t, wk_t, wv_t, bq_r, bk_r, bv_r)
        q_p, k_p, v_p = q_p[:N], k_p[:N], v_p[:N]

    # --- head split (== .view(...).transpose(1,2)); see TODO at top ---
    def to_heads(x2d):
        return x2d.reshape(B, S, h, d_k).transpose(0, 2, 1, 3)   # (B, h, S, d_k)

    Qh, Kh, Vh = to_heads(q_p), to_heads(k_p), to_heads(v_p)

    # --- flash-style attention ---
    tq = _pick_seq_tile(S)
    tk = _pick_seq_tile(S)
    grid = (B, h, S // tq, S // tk)
    q_spec = pl.BlockSpec((1, 1, tq, d_k), lambda b, hh, qi, ki: (b, hh, qi, 0))
    kv_spec = pl.BlockSpec((1, 1, tk, d_k), lambda b, hh, qi, ki: (b, hh, ki, 0))
    o_spec = pl.BlockSpec((1, 1, tq, d_k), lambda b, hh, qi, ki: (b, hh, qi, 0))
    scratch = [pltpu.VMEM((tq, 1), jnp.float32),       # running max m
               pltpu.VMEM((tq, 1), jnp.float32),       # running denom l
               pltpu.VMEM((tq, d_k), jnp.float32)]     # running accumulator
    attn_cparams = pltpu.CompilerParams(
        dimension_semantics=("parallel", "parallel", "parallel", "arbitrary"),
        vmem_limit_bytes=_VMEM_LIMIT)

    if mask is None:
        ctx = pl.pallas_call(
            functools.partial(_flash_attn_nobias_kernel, compute_dtype=compute_dtype),
            out_shape=jax.ShapeDtypeStruct((B, h, S, d_k), dtype),
            grid=grid,
            in_specs=[q_spec, kv_spec, kv_spec],
            out_specs=o_spec,
            scratch_shapes=scratch,
            compiler_params=attn_cparams,
        )(Qh, Kh, Vh)
    else:
        # Additive f32 bias in the mask's ORIGINAL shape — no broadcast_to.
        bias = jnp.where(mask == 0, jnp.float32(-1.0e9), jnp.float32(0.0))
        if bias.shape[1] == 1:   # encoder mask (B, 1, S): broadcast over queries in-kernel
            bias_spec = pl.BlockSpec((1, 1, tk), lambda b, hh, qi, ki: (b, 0, ki))
        else:                    # decoder mask (B, S, S)
            bias_spec = pl.BlockSpec((1, tq, tk), lambda b, hh, qi, ki: (b, qi, ki))
        ctx = pl.pallas_call(
            functools.partial(_flash_attn_bias_kernel, compute_dtype=compute_dtype),
            out_shape=jax.ShapeDtypeStruct((B, h, S, d_k), dtype),
            grid=grid,
            in_specs=[q_spec, kv_spec, kv_spec, bias_spec],
            out_specs=o_spec,
            scratch_shapes=scratch,
            compiler_params=attn_cparams,
        )(Qh, Kh, Vh, bias)

    # --- output projection: per-head accumulation, lane-dense (1, ts, D) writes ---
    ts = _pick_seq_tile(S)
    out = pl.pallas_call(
        functools.partial(_out_proj_kernel, num_heads=h, compute_dtype=compute_dtype),
        out_shape=jax.ShapeDtypeStruct((B, S, D), dtype),
        grid=(B, S // ts),
        in_specs=[pl.BlockSpec((1, h, ts, d_k), lambda b, si: (b, 0, si, 0)),
                  pl.BlockSpec((h, d_k, D), lambda b, si: (0, 0, 0)),
                  pl.BlockSpec((1, D), lambda b, si: (0, 0))],
        out_specs=pl.BlockSpec((1, ts, D), lambda b, si: (b, si, 0)),
        compiler_params=pltpu.CompilerParams(
            dimension_semantics=("parallel", "parallel"),
            vmem_limit_bytes=_VMEM_LIMIT),
    )(ctx, wo_heads, bo_r)

    return out


# ---------------------------------------------------------------------------
# Pure-JAX reference mirroring the PyTorch forward exactly.
# ---------------------------------------------------------------------------
def mha_reference(q, k, v, mask, params, h):
    B, S, D = q.shape
    d_k = D // h
    wq, bq, wk, bk, wv, bv, wo, bo = params

    def lin(x, w, b):
        return jnp.dot(x, w.T) + b

    def split(x):
        return x.reshape(B, S, h, d_k).transpose(0, 2, 1, 3)

    Q, K, V = split(lin(q, wq, bq)), split(lin(k, wk, bk)), split(lin(v, wv, bv))
    scores = jnp.einsum("bhqd,bhkd->bhqk", Q, K) / math.sqrt(d_k)
    if mask is not None:
        m = mask[:, None, :, :]
        scores = jnp.where(m == 0, -1.0e9, scores)
    p = jax.nn.softmax(scores, axis=-1)
    x = jnp.einsum("bhqk,bhkd->bhqd", p, V)
    x = x.transpose(0, 2, 1, 3).reshape(B, S, D)
    return lin(x, wo, bo)


if __name__ == "__main__":
    B, S, D, H = 2, 8, 32, 4

    key = jax.random.PRNGKey(0)
    ks = jax.random.split(key, 12)

    def w_init(kk):
        return jax.random.normal(kk, (D, D), jnp.float32) * 0.05

    def b_init(kk):
        return jax.random.normal(kk, (D,), jnp.float32) * 0.01

    params = (w_init(ks[0]), b_init(ks[1]),   # W_q, b_q
              w_init(ks[2]), b_init(ks[3]),   # W_k, b_k
              w_init(ks[4]), b_init(ks[5]),   # W_v, b_v
              w_init(ks[6]), b_init(ks[7]))   # W_o, b_o

    q = jax.random.normal(ks[8], (B, S, D), jnp.float32)
    k = jax.random.normal(ks[9], (B, S, D), jnp.float32)
    v = jax.random.normal(ks[10], (B, S, D), jnp.float32)

    # decoder-style (B, S, S) causal mask (0 = masked)
    causal = (jnp.arange(S)[None, :] <= jnp.arange(S)[:, None]).astype(jnp.int32)
    dec_mask = jnp.broadcast_to(causal, (B, S, S))

    # 1) cross-attention, decoder mask, f32
    out = jax.block_until_ready(multi_headed_attention(q, k, v, dec_mask, params, H))
    ref = mha_reference(q, k, v, dec_mask, params, H)
    assert out.shape == (B, S, D)
    assert jnp.allclose(out, ref, atol=2e-3, rtol=2e-3), "decoder-mask mismatch"

    # 2) self-attention (fused QKV weight path), encoder-style (B, 1, S) padding mask
    lens = jnp.array([S, S - 3])
    enc_mask = (jnp.arange(S)[None, :] < lens[:, None]).astype(jnp.int32)[:, None, :]
    out2 = jax.block_until_ready(multi_headed_attention(q, q, q, enc_mask, params, H))
    ref2 = mha_reference(q, q, q, enc_mask, params, H)
    assert jnp.allclose(out2, ref2, atol=2e-3, rtol=2e-3), "encoder-mask mismatch"

    # 3) mask=None path (bias-free attention kernel variant)
    out3 = jax.block_until_ready(multi_headed_attention(q, k, v, None, params, H))
    ref3 = mha_reference(q, k, v, None, params, H)
    assert jnp.allclose(out3, ref3, atol=2e-3, rtol=2e-3), "no-mask mismatch"

    # 4) bf16 MXU operands (v6e/v7x path), f32 softmax statistics kept
    out4 = jax.block_until_ready(
        multi_headed_attention(q, k, v, dec_mask, params, H, compute_dtype=jnp.bfloat16))
    assert jnp.allclose(out4, ref, atol=5e-2, rtol=5e-2), "bf16 mismatch"

    print("KERNEL_OK")
</pallas_src>

<mosaic_0001>
module attributes {stable_mosaic.version = 11 : i64} {
  func.func @_qkv_proj_kernel(%arg0: i32, %arg1: memref<16x32xf32, #tpu.memory_space<vmem>>, %arg2: memref<16x32xf32, #tpu.memory_space<vmem>>, %arg3: memref<16x32xf32, #tpu.memory_space<vmem>>, %arg4: memref<32x32xf32, #tpu.memory_space<vmem>>, %arg5: memref<32x32xf32, #tpu.memory_space<vmem>>, %arg6: memref<32x32xf32, #tpu.memory_space<vmem>>, %arg7: memref<1x32xf32, #tpu.memory_space<vmem>>, %arg8: memref<1x32xf32, #tpu.memory_space<vmem>>, %arg9: memref<1x32xf32, #tpu.memory_space<vmem>>, %arg10: memref<16x32xf32, #tpu.memory_space<vmem>>, %arg11: memref<16x32xf32, #tpu.memory_space<vmem>>, %arg12: memref<16x32xf32, #tpu.memory_space<vmem>>) attributes {dimension_semantics = [#tpu.dimension_semantics<parallel>], iteration_bounds = array<i64: 1>, scalar_prefetch = 0 : i64, scratch_operands = 0 : i64, tpu.core_type = #tpu.core_type<tc>, window_params = [{transform_indices = @transform_0, window_bounds = array<i64: 16, 32>}, {transform_indices = @transform_1, window_bounds = array<i64: 16, 32>}, {transform_indices = @transform_2, window_bounds = array<i64: 16, 32>}, {pipeline_mode = #tpu.pipeline_mode<synchronous>, transform_indices = @transform_3, window_bounds = array<i64: 32, 32>}, {pipeline_mode = #tpu.pipeline_mode<synchronous>, transform_indices = @transform_4, window_bounds = array<i64: 32, 32>}, {pipeline_mode = #tpu.pipeline_mode<synchronous>, transform_indices = @transform_5, window_bounds = array<i64: 32, 32>}, {pipeline_mode = #tpu.pipeline_mode<synchronous>, transform_indices = @transform_6, window_bounds = array<i64: 1, 32>}, {pipeline_mode = #tpu.pipeline_mode<synchronous>, transform_indices = @transform_7, window_bounds = array<i64: 1, 32>}, {pipeline_mode = #tpu.pipeline_mode<synchronous>, transform_indices = @transform_8, window_bounds = array<i64: 1, 32>}, {transform_indices = @transform_9, window_bounds = array<i64: 16, 32>}, {transform_indices = @transform_10, window_bounds = array<i64: 16, 32>}, {transform_indices = @transform_11, window_bounds = array<i64: 16, 32>}]} {
    %c0 = arith.constant 0 : index
    %c0_0 = arith.constant 0 : index
    %0 = vector.load %arg1[%c0, %c0_0] : memref<16x32xf32, #tpu.memory_space<vmem>>, vector<16x32xf32>
    %c0_1 = arith.constant 0 : index
    %c0_2 = arith.constant 0 : index
    %1 = vector.load %arg4[%c0_1, %c0_2] : memref<32x32xf32, #tpu.memory_space<vmem>>, vector<32x32xf32>
    %cst = arith.constant dense<0.000000e+00> : vector<16x32xf32>
    %2 = tpu.matmul %0, %1, %cst {dimension_numbers = #tpu.dot_dimension_numbers<[1], [0], [0], [1], [0, 0, 1, 1], [], []>} : vector<16x32xf32>, vector<32x32xf32>, vector<16x32xf32> -> vector<16x32xf32>
    %c0_3 = arith.constant 0 : index
    %c0_4 = arith.constant 0 : index
    %3 = vector.load %arg7[%c0_3, %c0_4] : memref<1x32xf32, #tpu.memory_space<vmem>>, vector<1x32xf32>
    %4 = vector.broadcast %3 : vector<1x32xf32> to vector<16x32xf32>
    %5 = arith.addf %2, %4 : vector<16x32xf32>
    %c0_5 = arith.constant 0 : index
    %c0_6 = arith.constant 0 : index
    %6 = vector.load %arg10[%c0_5, %c0_6] : memref<16x32xf32, #tpu.memory_space<vmem>>, vector<16x32xf32>
    tpu.vector_store %arg10[%c0_5, %c0_6], %5 {strides = array<i32>} : memref<16x32xf32, #tpu.memory_space<vmem>>, vector<16x32xf32>,
    %c0_7 = arith.constant 0 : index
    %c0_8 = arith.constant 0 : index
    %7 = vector.load %arg2[%c0_7, %c0_8] : memref<16x32xf32, #tpu.memory_space<vmem>>, vector<16x32xf32>
    %c0_9 = arith.constant 0 : index
    %c0_10 = arith.constant 0 : index
    %8 = vector.load %arg5[%c0_9, %c0_10] : memref<32x32xf32, #tpu.memory_space<vmem>>, vector<32x32xf32>
    %cst_11 = arith.constant dense<0.000000e+00> : vector<16x32xf32>
    %9 = tpu.matmul %7, %8, %cst_11 {dimension_numbers = #tpu.dot_dimension_numbers<[1], [0], [0], [1], [0, 0, 1, 1], [], []>} : vector<16x32xf32>, vector<32x32xf32>, vector<16x32xf32> -> vector<16x32xf32>
    %c0_12 = arith.constant 0 : index
    %c0_13 = arith.constant 0 : index
    %10 = vector.load %arg8[%c0_12, %c0_13] : memref<1x32xf32, #tpu.memory_space<vmem>>, vector<1x32xf32>
    %11 = vector.broadcast %10 : vector<1x32xf32> to vector<16x32xf32>
    %12 = arith.addf %9, %11 : vector<16x32xf32>
    %c0_14 = arith.constant 0 : index
    %c0_15 = arith.constant 0 : index
    %13 = vector.load %arg11[%c0_14, %c0_15] : memref<16x32xf32, #tpu.memory_space<vmem>>, vector<16x32xf32>
    tpu.vector_store %arg11[%c0_14, %c0_15], %12 {strides = array<i32>} : memref<16x32xf32, #tpu.memory_space<vmem>>, vector<16x32xf32>,
    %c0_16 = arith.constant 0 : index
    %c0_17 = arith.constant 0 : index
    %14 = vector.load %arg3[%c0_16, %c0_17] : memref<16x32xf32, #tpu.memory_space<vmem>>, vector<16x32xf32>
    %c0_18 = arith.constant 0 : index
    %c0_19 = arith.constant 0 : index
    %15 = vector.load %arg6[%c0_18, %c0_19] : memref<32x32xf32, #tpu.memory_space<vmem>>, vector<32x32xf32>
    %cst_20 = arith.constant dense<0.000000e+00> : vector<16x32xf32>
    %16 = tpu.matmul %14, %15, %cst_20 {dimension_numbers = #tpu.dot_dimension_numbers<[1], [0], [0], [1], [0, 0, 1, 1], [], []>} : vector<16x32xf32>, vector<32x32xf32>, vector<16x32xf32> -> vector<16x32xf32>
    %c0_21 = arith.constant 0 : index
    %c0_22 = arith.constant 0 : index
    %17 = vector.load %arg9[%c0_21, %c0_22] : memref<1x32xf32, #tpu.memory_space<vmem>>, vector<1x32xf32>
    %18 = vector.broadcast %17 : vector<1x32xf32> to vector<16x32xf32>
    %19 = arith.addf %16, %18 : vector<16x32xf32>
    %c0_23 = arith.constant 0 : index
    %c0_24 = arith.constant 0 : index
    %20 = vector.load %arg12[%c0_23, %c0_24] : memref<16x32xf32, #tpu.memory_space<vmem>>, vector<16x32xf32>
    tpu.vector_store %arg12[%c0_23, %c0_24], %19 {strides = array<i32>} : memref<16x32xf32, #tpu.memory_space<vmem>>, vector<16x32xf32>,
    return
  }
  func.func @transform_0(%arg0: i32) -> (i32, i32) {
    %c0_i32 = arith.constant 0 : i32
    %c0_i32_0 = arith.constant 0 : i32
    return %arg0, %c0_i32 : i32, i32
  }
  func.func @transform_1(%arg0: i32) -> (i32, i32) {
    %c0_i32 = arith.constant 0 : i32
    %c0_i32_0 = arith.constant 0 : i32
    return %arg0, %c0_i32 : i32, i32
  }
  func.func @transform_2(%arg0: i32) -> (i32, i32) {
    %c0_i32 = arith.constant 0 : i32
    %c0_i32_0 = arith.constant 0 : i32
    return %arg0, %c0_i32 : i32, i32
  }
  func.func @transform_3(%arg0: i32) -> (i32, i32) {
    %c0_i32 = arith.constant 0 : i32
    %c0_i32_0 = arith.constant 0 : i32
    %c0_i32_1 = arith.constant 0 : i32
    return %c0_i32, %c0_i32_0 : i32, i32
  }
  func.func @transform_4(%arg0: i32) -> (i32, i32) {
    %c0_i32 = arith.constant 0 : i32
    %c0_i32_0 = arith.constant 0 : i32
    %c0_i32_1 = arith.constant 0 : i32
    return %c0_i32, %c0_i32_0 : i32, i32
  }
  func.func @transform_5(%arg0: i32) -> (i32, i32) {
    %c0_i32 = arith.constant 0 : i32
    %c0_i32_0 = arith.constant 0 : i32
    %c0_i32_1 = arith.constant 0 : i32
    return %c0_i32, %c0_i32_0 : i32, i32
  }
  func.func @transform_6(%arg0: i32) -> (i32, i32) {
    %c0_i32 = arith.constant 0 : i32
    %c0_i32_0 = arith.constant 0 : i32
    %c0_i32_1 = arith.constant 0 : i32
    return %c0_i32, %c0_i32_0 : i32, i32
  }
  func.func @transform_7(%arg0: i32) -> (i32, i32) {
    %c0_i32 = arith.constant 0 : i32
    %c0_i32_0 = arith.constant 0 : i32
    %c0_i32_1 = arith.constant 0 : i32
    return %c0_i32, %c0_i32_0 : i32, i32
  }
  func.func @transform_8(%arg0: i32) -> (i32, i32) {
    %c0_i32 = arith.constant 0 : i32
    %c0_i32_0 = arith.constant 0 : i32
    %c0_i32_1 = arith.constant 0 : i32
    return %c0_i32, %c0_i32_0 : i32, i32
  }
  func.func @transform_9(%arg0: i32) -> (i32, i32) {
    %c0_i32 = arith.constant 0 : i32
    %c0_i32_0 = arith.constant 0 : i32
    return %arg0, %c0_i32 : i32, i32
  }
  func.func @transform_10(%arg0: i32) -> (i32, i32) {
    %c0_i32 = arith.constant 0 : i32
    %c0_i32_0 = arith.constant 0 : i32
    return %arg0, %c0_i32 : i32, i32
  }
  func.func @transform_11(%arg0: i32) -> (i32, i32) {
    %c0_i32 = arith.constant 0 : i32
    %c0_i32_0 = arith.constant 0 : i32
    return %arg0, %c0_i32 : i32, i32
  }
}

</mosaic_0001>

<bundles_post_ra>
// kernel: tpu_custom_call.1
= control target key start
LH: loop header
LB: loop body
LE: loop exit
PB: predicated region body
PF: predicated region fallthrough
CT: control target
= control target key end

     0   :  { %17 = vsyncpa [#allocation3], 0  ;;  %s1019_s0 = inlined_call_operand.hbm [shape: f32[16,32], index: 0, kind: input, shape index: {}]   ;;  %s1020_s1 = inlined_call_operand.hbm [shape: f32[16,32], index: 1, kind: input, shape index: {}]   ;;  %s1021_s2 = inlined_call_operand.hbm [shape: f32[16,32], index: 2, kind: input, shape index: {}]   ;;  %s1022_s3 = inlined_call_operand.hbm [shape: f32[32,32], index: 3, kind: input, shape index: {}]   ;;  %s1023_s4 = inlined_call_operand.hbm [shape: f32[32,32], index: 4, kind: input, shape index: {}]   ;;  %s1024_s5 = inlined_call_operand.hbm [shape: f32[32,32], index: 5, kind: input, shape index: {}]   ;;  %s1025_s6 = inlined_call_operand.vmem [shape: f32[1,32], index: 6, kind: input, shape index: {}]   ;;  %s1026_s7 = inlined_call_operand.vmem [shape: f32[1,32], index: 7, kind: input, shape index: {}]   ;;  %s1027_s8 = inlined_call_operand.vmem [shape: f32[1,32], index: 8, kind: input, shape index: {}]   ;;  %s1028_s9 = inlined_call_operand.hbm [shape: f32[16,32], index: 9, kind: output, shape index: {0}]   ;;  %s1029_s10 = inlined_call_operand.hbm [shape: f32[16,32], index: 10, kind: output, shape index: {1}]   ;;  %s1030_s11 = inlined_call_operand.hbm [shape: f32[16,32], index: 11, kind: output, shape index: {2}]  }
   0x1   :  { %18 = vsyncpa [#allocation6], 0 }
   0x2   :  { %19 = vsyncpa [#allocation9], 0 }
   0x3   :  { %20 = vsyncpa [#allocation12], 0 }
   0x4   :  { %21 = vsyncpa [#allocation4], 0 }
   0x5   :  { %22 = vsyncpa [#allocation15], 0  ;;  %s764_s17 = smov [#allocation5]   ;;  %s765_s19 = smov [#allocation8]  }
   0x6   :  { %s40_s18 = sshll.u32 %s764_s17, 4  ;;  %s64_s20 = sshll.u32 %s765_s19, 4  ;;  %s41_s18 = int_to_ptr.vmem [resolvable:$true] %s40_s18  ;;  %s835_s20 = int_to_ptr.vmem [resolvable:$true] %s64_s20 }
   0x7   :  { %s554_s23 = scalar_lea.hbm %s1020_s1, 256 }
   0x8   :  { %p555_p0 = scmp.ne.s32.totalorder %s1020_s1, %s554_s23  ;;  %p558_p1 = scmp.lt.u32.totalorder %s554_s23, %s1020_s1 }
   0xa   :  { %p560_p2 = pnand %p558_p1, %p555_p0 }
   0xc   :  { %563 = shalt.err (!%p560_p2)
}
   0xd   :  { %s564_s28 = scalar_lea.vmem %s41_s18, 256  ;;  %p569_p4 = scmp.lt.s32.totalorder %s41_s18, %s41_s18 }
   0xe   :  { %p565_p3 = scmp.ne.s32.totalorder %s41_s18, %s564_s28  ;;  %p570_p5 = scmp.lt.s32.totalorder %s564_s28, %s564_s28 }
  0x10   :  { %p571_p6 = por %p570_p5, %p569_p4 }
  0x12   :  { %p572_p7 = pnand %p571_p6, %p565_p3 }
  0x14   :  { %575 = shalt.err (!%p572_p7)
}
  0x15   :  { %s766_s29 = smov 128   ;;  %s767_s30 = smov 8  }
  0x16   :  { %46 = dma.hbm_to_vmem [thread:$0]  %s1020_s1, 256, %s41_s18, [#allocation6], %s766_s29, %s766_s29, %s767_s30  }
  0x17   :  { %s576_s16 = scalar_lea.hbm %s1022_s3, 512 }
  0x18   :  { %p577_p8 = scmp.ne.s32.totalorder %s1022_s3, %s576_s16  ;;  %p580_p9 = scmp.lt.u32.totalorder %s576_s16, %s1022_s3 }
  0x1a   :  { %p582_p10 = pnand %p580_p9, %p577_p8 }
  0x1c   :  { %585 = shalt.err (!%p582_p10)
}
  0x1d   :  { %s586_s23 = scalar_lea.vmem %s835_s20, 512  ;;  %p591_p12 = scmp.lt.s32.totalorder %s835_s20, %s835_s20 }
  0x1e   :  { %p587_p11 = scmp.ne.s32.totalorder %s835_s20, %s586_s23  ;;  %p592_p13 = scmp.lt.s32.totalorder %s586_s23, %s586_s23 }
  0x20   :  { %p593_p0 = por %p592_p13, %p591_p12 }
  0x22   :  { %p594_p1 = pnand %p593_p0, %p587_p11 }
  0x24   :  { %597 = shalt.err (!%p594_p1)
}
  0x25   :  { %70 = dma.hbm_to_vmem [thread:$0]  %s1022_s3, 512, %s835_s20, [#allocation9], %s766_s29, %s766_s29, %s767_s30  }
  0x26   :  { %s768_s24 = smov [#allocation2]   ;;  %s769_s26 = smov [#allocation7]  }
  0x27   :  { %s28_s25 = sshll.u32 %s768_s24, 4  ;;  %s52_s27 = sshll.u32 %s769_s26, 4  ;;  %s29_s25 = int_to_ptr.vmem [resolvable:$true] %s28_s25  ;;  %s872_s27 = int_to_ptr.vmem [resolvable:$true] %s52_s27 }
  0x28   :  { %s598_s13 = scalar_lea.hbm %s1019_s0, 256 }
  0x29   :  { %p599_p2 = scmp.ne.s32.totalorder %s1019_s0, %s598_s13  ;;  %p602_p3 = scmp.lt.u32.totalorder %s598_s13, %s1019_s0 }
  0x2b   :  { %p604_p4 = pnand %p602_p3, %p599_p2 }
  0x2d   :  { %607 = shalt.err (!%p604_p4)
}
  0x2e   :  { %s608_s3 = scalar_lea.vmem %s29_s25, 256  ;;  %p613_p6 = scmp.lt.s32.totalorder %s29_s25, %s29_s25 }
  0x2f   :  { %p609_p5 = scmp.ne.s32.totalorder %s29_s25, %s608_s3  ;;  %p614_p7 = scmp.lt.s32.totalorder %s608_s3, %s608_s3 }
  0x31   :  { %p615_p8 = por %p614_p7, %p613_p6 }
  0x33   :  { %p616_p9 = pnand %p615_p8, %p609_p5 }
  0x35   :  { %619 = shalt.err (!%p616_p9)
}
  0x36   :  { %34 = dma.hbm_to_vmem [thread:$0]  %s1019_s0, 256, %s29_s25, [#allocation3], %s766_s29, %s766_s29, %s767_s30  }
  0x37   :  { %s620_s23 = scalar_lea.hbm %s1021_s2, 256 }
  0x38   :  { %p621_p10 = scmp.ne.s32.totalorder %s1021_s2, %s620_s23  ;;  %p624_p11 = scmp.lt.u32.totalorder %s620_s23, %s1021_s2 }
  0x3a   :  { %p626_p12 = pnand %p624_p11, %p621_p10 }
  0x3c   :  { %629 = shalt.err (!%p626_p12)
}
  0x3d   :  { %s630_s28 = scalar_lea.vmem %s872_s27, 256  ;;  %p635_p0 = scmp.lt.s32.totalorder %s872_s27, %s872_s27 }
  0x3e   :  { %p631_p13 = scmp.ne.s32.totalorder %s872_s27, %s630_s28  ;;  %p636_p1 = scmp.lt.s32.totalorder %s630_s28, %s630_s28 }
  0x40   :  { %p637_p2 = por %p636_p1, %p635_p0 }
  0x42   :  { %p638_p3 = pnand %p637_p2, %p631_p13 }
  0x44   :  { %641 = shalt.err (!%p638_p3)
}
  0x45   :  { %58 = dma.hbm_to_vmem [thread:$0]  %s1021_s2, 256, %s872_s27, [#allocation6], %s766_s29, %s766_s29, %s767_s30  }
  0x46   :  { %s770_s12 = smov [#allocation10]   ;;  %s771_s14 = smov [#allocation11]  }
  0x47   :  { %s76_s13 = sshll.u32 %s770_s12, 4  ;;  %s88_s15 = sshll.u32 %s771_s14, 4  ;;  %s77_s13 = int_to_ptr.vmem [resolvable:$true] %s76_s13  ;;  %s909_s15 = int_to_ptr.vmem [resolvable:$true] %s88_s15 }
  0x48   :  { %s642_s3 = scalar_lea.hbm %s1023_s4, 512 }
  0x49   :  { %p643_p4 = scmp.ne.s32.totalorder %s1023_s4, %s642_s3  ;;  %p646_p5 = scmp.lt.u32.totalorder %s642_s3, %s1023_s4 }
  0x4b   :  { %p648_p6 = pnand %p646_p5, %p643_p4 }
  0x4d   :  { %651 = shalt.err (!%p648_p6)
}
  0x4e   :  { %s652_s2 = scalar_lea.vmem %s77_s13, 512  ;;  %p657_p8 = scmp.lt.s32.totalorder %s77_s13, %s77_s13 }
  0x4f   :  { %p653_p7 = scmp.ne.s32.totalorder %s77_s13, %s652_s2  ;;  %p658_p9 = scmp.lt.s32.totalorder %s652_s2, %s652_s2 }
  0x51   :  { %p659_p10 = por %p658_p9, %p657_p8 }
  0x53   :  { %p660_p11 = pnand %p659_p10, %p653_p7 }
  0x55   :  { %663 = shalt.err (!%p660_p11)
}
  0x56   :  { %82 = dma.hbm_to_vmem [thread:$0]  %s1023_s4, 512, %s77_s13, [#allocation9], %s766_s29, %s766_s29, %s767_s30  }
  0x57   :  { %s664_s24 = scalar_lea.hbm %s1024_s5, 512 }
  0x58   :  { %p665_p12 = scmp.ne.s32.totalorder %s1024_s5, %s664_s24  ;;  %p668_p13 = scmp.lt.u32.totalorder %s664_s24, %s1024_s5 }
  0x5a   :  { %p670_p0 = pnand %p668_p13, %p665_p12 }
  0x5c   :  { %673 = shalt.err (!%p670_p0)
}
  0x5d   :  { %s674_s12 = scalar_lea.vmem %s909_s15, 512  ;;  %p679_p2 = scmp.lt.s32.totalorder %s909_s15, %s909_s15 }
  0x5e   :  { %p675_p1 = scmp.ne.s32.totalorder %s909_s15, %s674_s12  ;;  %p680_p3 = scmp.lt.s32.totalorder %s674_s12, %s674_s12 }
  0x60   :  { %p681_p4 = por %p680_p3, %p679_p2 }
  0x62   :  { %p682_p5 = pnand %p681_p4, %p675_p1 }
  0x64   :  { %685 = shalt.err (!%p682_p5)
}
  0x65   :  { %94 = dma.hbm_to_vmem [thread:$0]  %s1024_s5, 512, %s909_s15, [#allocation12], %s766_s29, %s766_s29, %s767_s30  }
  0x66   :  { %752 = dma.done.wait [#allocation3], 256  }
  0x67   :  { %753 = vsyncadd [#allocation3], 4294967040 }
  0x68   :  { %754 = dma.done.wait [#allocation6], 512  }
  0x69   :  { %755 = vsyncadd [#allocation6], 4294966784 }
  0x6a   :  { %756 = dma.done.wait [#allocation9], 1024  }
  0x6b   :  { %757 = vsyncadd [#allocation9], 4294966272 }
  0x6c   :  { %758 = dma.done.wait [#allocation12], 512  }
  0x6d   :  { %759 = vsyncadd [#allocation12], 4294966784  ;;  %v121_v0 = vld [vmem:[#allocation8] sm:$0xff]  ;;  %v122_v1 = vld [vmem:[#allocation8 + $0x8] sm:$0xff]  ;;  %vm132_vm0 = vcmask 261120   ;;  %s772_s17 = smov [#allocation13]  }
  0x6e   :  { %v123_v2 = vld [vmem:[#allocation8 + $0x10] sm:$0xff]  ;;  %v519_v3 = vpack.c.bf16 %v122_v1, %v121_v0  ;;  %v124_v4 = vld [vmem:[#allocation8 + $0x18] sm:$0xff]  ;;  %v218_v5 = vld [vmem:[#allocation10] sm:$0xff]  ;;  %s413_s3 = sshll.u32 %s772_s17, 4  ;;  %s773_s20 = smov [#allocation14]   ;;  %s414_s3 = int_to_ptr.vmem [resolvable:$true] %s413_s3 }
  0x6f   :  { %v219_v6 = vld [vmem:[#allocation10 + $0x8] sm:$0xff]  ;;  %v523_v7 = vpack.c.bf16 %v124_v4, %v123_v2  ;;  %v119_v9 = vld [vmem:[#allocation2] sm:$0xff]  ;;  %v314_v10 = vld [vmem:[#allocation11] sm:$0xff]  ;;  %s425_s19 = sshll.u32 %s773_s20, 4  ;;  %s686_s21 = scalar_lea.vmem %s414_s3, 256  ;;  %s959_s19 = int_to_ptr.vmem [resolvable:$true] %s425_s19 }
  0x70   :  { %v527_v8 = vpack.c.bf16 %v219_v6, %v218_v5  ;;  %520 = vmatprep.subr.bf16.mxu0 %v519_v3  ;;  %494 = vmatprep.mubr.msk.f32.mxu0 %vm132_vm0, %v119_v9  ;;  %v315_v11 = vld [vmem:[#allocation11 + $0x8] sm:$0xff]  ;;  %v220_v12 = vld [vmem:[#allocation10 + $0x10] sm:$0xff]  ;;  %v221_v13 = vld [vmem:[#allocation10 + $0x18] sm:$0xff]  ;;  %p687_p6 = scmp.ne.s32.totalorder %s414_s3, %s686_s21  ;;  %p691_p7 = scmp.lt.s32.totalorder %s414_s3, %s414_s3 }
  0x71   :  { %522 = vmatpush3.bf16.msra.mxu0 %v519_v3  ;;  %v531_v14 = vpack.c.bf16 %v221_v13, %v220_v12  ;;  %v216_v15 = vld [vmem:[#allocation5] sm:$0xff]  ;;  %v535_v16 = vpack.c.bf16 %v315_v11, %v314_v10  ;;  %v316_v17 = vld [vmem:[#allocation11 + $0x10] sm:$0xff]  ;;  %v317_v18 = vld [vmem:[#allocation11 + $0x18] sm:$0xff]  ;;  %p692_p8 = scmp.lt.s32.totalorder %s686_s21, %s686_s21 }
  0x72   :  { %528 = vmatprep.subr.bf16.mxu1 %v527_v8  ;;  %524 = vmatprep.subr.bf16.mxu0 %v523_v7  ;;  %v120_v19 = vld [vmem:[#allocation2 + $0x8] sm:$0xff]  ;;  %v539_v20 = vpack.c.bf16 %v317_v18, %v316_v17  ;;  %v217_v21 = vld [vmem:[#allocation5 + $0x8] sm:$0xff]  ;;  %v312_v22 = vld [vmem:[#allocation7] sm:$0xff] }
  0x73   :  { %530 = vmatpush3.bf16.msra.mxu1 %v527_v8  ;;  %505 = vmatprep.mubr.msk.f32.mxu1 %vm132_vm0, %v216_v15  ;;  %v313_v23 = vld [vmem:[#allocation7 + $0x8] sm:$0xff]  ;;  %v459_v24 = vld [vmem:[%s1025_s6] ss:$0 sm:$0xff]  ;;  %p693_p9 = por %p692_p8, %p691_p7 }
  0x74   :  { %532 = vmatprep.subr.bf16.mxu1 %v531_v14  ;;  %v462_v25 = vld [vmem:[%s1026_s7] ss:$0 sm:$0xff] }
  0x75   :  { %526 = vmatpush3.bf16.msra.mxu0 %v523_v7  ;;  %v465_v34 = vld [vmem:[%s1027_s8] ss:$0 sm:$0xff]  ;;  %p694_p10 = pnand %p693_p9, %p687_p6 }
  0x76   :  { %536 = vmatprep.subr.bf16.mxu0 %v535_v16 }
  0x77   :  { %534 = vmatpush3.bf16.msra.mxu1 %v531_v14 }
  0x78   :  { %495 = vmatmul.mubr.msk.f32.vlgmr.msra.gmra.mrb[0].mxu0 %vm132_vm0, %v120_v19 }
  0x79   :  { %538 = vmatpush3.bf16.msra.mxu0 %v535_v16  ;;  %516 = vmatprep.mubr.msk.f32.mxu0 %vm132_vm0, %v312_v22 }
  0x7a   :  { %506 = vmatmul.mubr.msk.f32.vlgmr.msra.gmra.mrb[0].mxu1 %vm132_vm0, %v217_v21  ;;  %540 = vmatprep.subr.bf16.mxu0 %v539_v20 }
  0x7d   :  { %542 = vmatpush3.bf16.msra.mxu0 %v539_v20 }
  0x80   :  { %517 = vmatmul.mubr.msk.f32.vlgmr.msra.gmra.mrb[2].mxu0 %vm132_vm0, %v313_v23 }
 0x14b   :  { %v496_v26 = vpop.f32.mrb[0].mxu0 }
 0x14c   :  { %v211_v27 = vadd.f32 %v496_v26, %v459_v24  ;;  %v205_v28 = vpop.f32.mrb[1].mxu0 }
 0x14d   :  { %v507_v29 = vpop.f32.mrb[0].mxu1  ;;  %v206_v30 = vadd.f32 %v459_v24, %v205_v28 }
 0x14e   :  { %v307_v31 = vadd.f32 %v507_v29, %v462_v25  ;;  %v301_v32 = vpop.f32.mrb[1].mxu1  ;;  %215 = vst.msk [vmem:[#allocation13 + $0x8] sm:$0xff] %vm132_vm0, %v211_v27 }
 0x14f   :  { %v302_v33 = vadd.f32 %v462_v25, %v301_v32  ;;  %214 = vst.msk [vmem:[#allocation13] sm:$0xff] %vm132_vm0, %v206_v30 }
 0x150   :  { %311 = vst.msk [vmem:[#allocation14 + $0x8] sm:$0xff] %vm132_vm0, %v307_v31 }
 0x151   :  { %310 = vst.msk [vmem:[#allocation14] sm:$0xff] %vm132_vm0, %v302_v33 }
 0x152   :  { %697 = shalt.err (!%p694_p10)
}
 0x153   :  { %s698_s27 = scalar_lea.hbm %s1028_s9, 256 }
 0x154   :  { %p699_p11 = scmp.ne.s32.totalorder %s1028_s9, %s698_s27  ;;  %p702_p12 = scmp.lt.u32.totalorder %s698_s27, %s1028_s9 }
 0x156   :  { %p704_p13 = pnand %p702_p12, %p699_p11 }
 0x158   :  { %707 = shalt.err (!%p704_p13)
}
 0x159   :  { %419 = dma.vmem_to_hbm [thread:$0]  %s414_s3, 256, %s1028_s9, [#allocation4], %s766_s29, %s766_s29, %s767_s30  }
 0x15a   :  { %s708_s28 = scalar_lea.vmem %s959_s19, 256  ;;  %p713_p1 = scmp.lt.s32.totalorder %s959_s19, %s959_s19 }
 0x15b   :  { %p709_p0 = scmp.ne.s32.totalorder %s959_s19, %s708_s28  ;;  %p714_p2 = scmp.lt.s32.totalorder %s708_s28, %s708_s28 }
 0x15d   :  { %p715_p3 = por %p714_p2, %p713_p1 }
 0x15f   :  { %p716_p4 = pnand %p715_p3, %p709_p0 }
 0x161   :  { %719 = shalt.err (!%p716_p4)
}
 0x162   :  { %s720_s12 = scalar_lea.hbm %s1029_s10, 256 }
 0x163   :  { %p721_p5 = scmp.ne.s32.totalorder %s1029_s10, %s720_s12  ;;  %p724_p6 = scmp.lt.u32.totalorder %s720_s12, %s1029_s10 }
 0x165   :  { %p726_p7 = pnand %p724_p6, %p721_p5 }
 0x167   :  { %729 = shalt.err (!%p726_p7)
}
 0x168   :  { %431 = dma.vmem_to_hbm [thread:$0]  %s959_s19, 256, %s1029_s10, [#allocation15], %s766_s29, %s766_s29, %s767_s30   ;;  %v518_v35 = vpop.f32.mrb[2].mxu0 }
 0x169   :  { %s774_s16 = smov [#allocation16]   ;;  %v403_v36 = vadd.f32 %v518_v35, %v465_v34  ;;  %v397_v37 = vpop.f32.mrb[3].mxu0 }
 0x16a   :  { %s437_s17 = sshll.u32 %s774_s16, 4  ;;  %v398_v38 = vadd.f32 %v465_v34, %v397_v37  ;;  %s438_s17 = int_to_ptr.vmem [resolvable:$true] %s437_s17 }
 0x16b   :  { %407 = vst.msk [vmem:[#allocation16 + $0x8] sm:$0xff] %vm132_vm0, %v403_v36  ;;  %s730_s3 = scalar_lea.vmem %s438_s17, 256  ;;  %p735_p9 = scmp.lt.s32.totalorder %s438_s17, %s438_s17 }
 0x16c   :  { %406 = vst.msk [vmem:[#allocation16] sm:$0xff] %vm132_vm0, %v398_v38  ;;  %p731_p8 = scmp.ne.s32.totalorder %s438_s17, %s730_s3  ;;  %p736_p10 = scmp.lt.s32.totalorder %s730_s3, %s730_s3 }
 0x16e   :  { %p737_p11 = por %p736_p10, %p735_p9 }
 0x170   :  { %p738_p12 = pnand %p737_p11, %p731_p8 }
 0x172   :  { %741 = shalt.err (!%p738_p12)
}
 0x173   :  { %s742_s19 = scalar_lea.hbm %s1030_s11, 256 }
 0x174   :  { %p743_p13 = scmp.ne.s32.totalorder %s1030_s11, %s742_s19  ;;  %p746_p0 = scmp.lt.u32.totalorder %s742_s19, %s1030_s11 }
 0x176   :  { %p748_p1 = pnand %p746_p0, %p743_p13 }
 0x178   :  { %751 = shalt.err (!%p748_p1)
}
 0x179   :  { %443 = dma.vmem_to_hbm [thread:$0]  %s438_s17, 256, %s1030_s11, [#allocation15], %s766_s29, %s766_s29, %s767_s30  }
 0x17a   :  { %760 = dma.done.wait [#allocation4], 256  }
 0x17b   :  { %761 = vsyncadd [#allocation4], 4294967040 }
 0x17c   :  { %762 = dma.done.wait [#allocation15], 512  }
 0x17d   :  { %763 = vsyncadd [#allocation15], 4294966784 }
 0x17e   :  { %453 = vsyncpa [#allocation3], 1 }
 0x17f   :  { %454 = vsyncpa [#allocation6], 1 }
 0x180   :  { %455 = vsyncpa [#allocation9], 1 }
 0x181   :  { %456 = vsyncpa [#allocation12], 1 }
 0x182   :  { %457 = vsyncpa [#allocation4], 1 }
 0x183   :  { %458 = vsyncpa [#allocation15], 1 }

</bundles_post_ra>
